<compile_context>
chip_gen: v7x
topology: tpu7x:2x2x1
jax: 0.10.0
libtpu: 0.0.40
codegen_flags: <defaults>
</compile_context>

<pallas_src>
import functools

import jax
import jax.numpy as jnp
from jax.experimental import pallas as pl
from jax.experimental.pallas import tpu as pltpu

_TILE_N_MAX = 256          # token rows per grid step
_NEG_FILL = -1e30          # fill for padded vocab columns (exp() underflows to 0)


def _round_up(x, m):
    return ((x + m - 1) // m) * m


def bigram_loss_kernel(idx_ref, tgt_ref, table_ref, logits_ref, partial_ref,
                       *, n_valid):
    """One row-tile: embedding gather (MXU) + logits store + partial NLL sum."""
    tile_n, vp = logits_ref.shape

    idx = idx_ref[...]                                            # (tile_n, 1)
    tgt = tgt_ref[...]                                            # (tile_n, 1)
    lanes = jax.lax.broadcasted_iota(jnp.int32, (tile_n, vp), 1)

    # Embedding lookup as one-hot matmul (exact in f32: 0/1 weights).
    onehot_idx = (lanes == idx).astype(jnp.float32)
    logits = jnp.dot(onehot_idx, table_ref[...],
                     preferred_element_type=jnp.float32)          # (tile_n, vp)
    logits_ref[...] = logits

    # Cross-entropy pieces (padded vocab columns hold _NEG_FILL -> exp == 0).
    m = jnp.max(logits, axis=-1, keepdims=True)
    z = logits - m
    lse = jnp.log(jnp.sum(jnp.exp(z), axis=-1, keepdims=True))
    onehot_tgt = (lanes == tgt).astype(jnp.float32)
    tgt_z = jnp.sum(onehot_tgt * z, axis=-1, keepdims=True)
    nll = lse - tgt_z                                             # (tile_n, 1)

    # Mask rows beyond the real token count, then emit a scalar partial sum.
    row = (pl.program_id(0) * tile_n
           + jax.lax.broadcasted_iota(jnp.int32, (tile_n, 1), 0))
    nll = jnp.where(row < n_valid, nll, 0.0)
    partial_ref[0, 0] = jnp.sum(nll)


def bigram_logits_kernel(idx_ref, table_ref, logits_ref):
    """Logits-only variant (targets=None path): no softmax / NLL work."""
    tile_n, vp = logits_ref.shape
    idx = idx_ref[...]
    lanes = jax.lax.broadcasted_iota(jnp.int32, (tile_n, vp), 1)
    onehot_idx = (lanes == idx).astype(jnp.float32)
    logits_ref[...] = jnp.dot(onehot_idx, table_ref[...],
                              preferred_element_type=jnp.float32)


def _layout(index, table):
    """Pad vocab to 128 lanes and tokens to a whole number of row tiles."""
    B, T = index.shape
    V = table.shape[0]
    N = B * T
    Vp = _round_up(V, 128)
    tile_n = _TILE_N_MAX if N >= _TILE_N_MAX else _round_up(N, 8)
    n_pad = _round_up(N, tile_n)
    num_tiles = n_pad // tile_n

    table_p = jnp.pad(table.astype(jnp.float32),
                      ((0, Vp - V), (0, Vp - V)),
                      constant_values=_NEG_FILL)
    idx2 = jnp.pad(index.reshape(N, 1).astype(jnp.int32),
                   ((0, n_pad - N), (0, 0)))
    return N, V, Vp, tile_n, n_pad, num_tiles, table_p, idx2


def _compiler_params(tile_n, vp):
    # Explicit VMEM budget: resident table + double-buffered logits/idx/tgt
    # tiles + generous slack; capped at v7x's 64 MiB physical VMEM.
    need = vp * vp * 4 + 4 * tile_n * vp * 4 + 4 * tile_n * 4 * 2
    return pltpu.CompilerParams(
        dimension_semantics=("parallel",),
        vmem_limit_bytes=min(need + (16 << 20), 64 << 20),
    )


@jax.jit
def bigram_forward(index, targets, table):
    """Equivalent of BigramLanguageModel.forward(index, targets).

    Returns (logits of shape (B, T, V), scalar mean cross-entropy loss)."""
    B, T = index.shape
    N, V, Vp, tile_n, n_pad, num_tiles, table_p, idx2 = _layout(index, table)
    tgt2 = jnp.pad(targets.reshape(N, 1).astype(jnp.int32),
                   ((0, n_pad - N), (0, 0)))

    kernel = functools.partial(bigram_loss_kernel, n_valid=N)

    logits_flat, partials = pl.pallas_call(
        kernel,
        out_shape=(
            jax.ShapeDtypeStruct((n_pad, Vp), jnp.float32),
            jax.ShapeDtypeStruct((num_tiles, 1), jnp.float32),
        ),
        grid=(num_tiles,),
        in_specs=[
            pl.BlockSpec((tile_n, 1), lambda i: (i, 0)),
            pl.BlockSpec((tile_n, 1), lambda i: (i, 0)),
            pl.BlockSpec((Vp, Vp), lambda i: (0, 0)),   # table stays resident
        ],
        out_specs=(
            pl.BlockSpec((tile_n, Vp), lambda i: (i, 0)),
            pl.BlockSpec((1, 1), lambda i: (i, 0),
                         memory_space=pltpu.MemorySpace.SMEM),
        ),
        compiler_params=_compiler_params(tile_n, Vp),
    )(idx2, tgt2, table_p)

    logits = logits_flat[:N, :V].reshape(B, T, V)
    loss = jnp.sum(partials) / N
    return logits, loss


@jax.jit
def bigram_forward_no_targets(index, table):
    """forward(index, targets=None): logits only (loss is None in the glue)."""
    B, T = index.shape
    N, V, Vp, tile_n, n_pad, num_tiles, table_p, idx2 = _layout(index, table)

    logits_flat = pl.pallas_call(
        bigram_logits_kernel,
        out_shape=jax.ShapeDtypeStruct((n_pad, Vp), jnp.float32),
        grid=(num_tiles,),
        in_specs=[
            pl.BlockSpec((tile_n, 1), lambda i: (i, 0)),
            pl.BlockSpec((Vp, Vp), lambda i: (0, 0)),
        ],
        out_specs=pl.BlockSpec((tile_n, Vp), lambda i: (i, 0)),
        compiler_params=_compiler_params(tile_n, Vp),
    )(idx2, table_p)

    return logits_flat[:N, :V].reshape(B, T, V)


def reference_forward(index, targets, table):
    # Pure-JAX reference for a sanity check.
    logits = table[index]                                         # (B, T, V)
    B, T, V = logits.shape
    lf = logits.reshape(B * T, V)
    tf = targets.reshape(B * T)
    logp = jax.nn.log_softmax(lf, axis=-1)
    loss = -jnp.mean(logp[jnp.arange(B * T), tf])
    return logits, loss


def _check(B, T, V, seed):
    key = jax.random.PRNGKey(seed)
    k_tab, k_idx, k_tgt = jax.random.split(key, 3)

    # nn.Embedding(V, V) default init: N(0, 1)
    table = jax.random.normal(k_tab, (V, V), dtype=jnp.float32)
    index = jax.random.randint(k_idx, (B, T), 0, V, dtype=jnp.int32)
    targets = jax.random.randint(k_tgt, (B, T), 0, V, dtype=jnp.int32)

    logits, loss = bigram_forward(index, targets, table)
    logits_nt = bigram_forward_no_targets(index, table)
    jax.block_until_ready((logits, loss, logits_nt))

    ref_logits, ref_loss = reference_forward(index, targets, table)
    assert logits.shape == (B, T, V)
    assert jnp.allclose(logits, ref_logits, rtol=1e-5, atol=1e-5)
    assert jnp.allclose(loss, ref_loss, rtol=1e-5, atol=1e-5)
    assert jnp.allclose(logits_nt, ref_logits, rtol=1e-5, atol=1e-5)


if __name__ == "__main__":
    # Lane-aligned toy case: vocab 128, batch=2, seq=8.
    _check(B=2, T=8, V=128, seed=0)
    # Non-aligned case: odd vocab (padded to 128 lanes) and B*T not a multiple
    # of 8 (exercises the row mask in the loss).
    _check(B=3, T=5, V=65, seed=0)

    # TODO(synk): generate() is a host-side Python sampling loop
    # (torch.multinomial); it is not a kernel hot path and is omitted.
    print("KERNEL_OK")
</pallas_src>

<mosaic_0001>
module attributes {stable_mosaic.version = 11 : i64} {
  func.func @bigram_loss_kernel(%arg0: i32, %arg1: memref<16x1xi32, #tpu.memory_space<vmem>>, %arg2: memref<16x1xi32, #tpu.memory_space<vmem>>, %arg3: memref<128x128xf32, #tpu.memory_space<vmem>>, %arg4: memref<16x128xf32, #tpu.memory_space<vmem>>, %arg5: memref<1x1xf32, #tpu.memory_space<smem>>) attributes {dimension_semantics = [#tpu.dimension_semantics<parallel>], iteration_bounds = array<i64: 1>, scalar_prefetch = 0 : i64, scratch_operands = 0 : i64, tpu.core_type = #tpu.core_type<tc>, window_params = [{transform_indices = @transform_0, window_bounds = array<i64: 16, 1>}, {transform_indices = @transform_1, window_bounds = array<i64: 16, 1>}, {pipeline_mode = #tpu.pipeline_mode<synchronous>, transform_indices = @transform_2, window_bounds = array<i64: 128, 128>}, {transform_indices = @transform_3, window_bounds = array<i64: 16, 128>}, {transform_indices = @transform_4, window_bounds = array<i64: 1, 1>}]} {
    %c0 = arith.constant 0 : index
    %c0_0 = arith.constant 0 : index
    %0 = vector.load %arg1[%c0, %c0_0] : memref<16x1xi32, #tpu.memory_space<vmem>>, vector<16x1xi32>
    %c0_1 = arith.constant 0 : index
    %c0_2 = arith.constant 0 : index
    %1 = vector.load %arg2[%c0_1, %c0_2] : memref<16x1xi32, #tpu.memory_space<vmem>>, vector<16x1xi32>
    %2 = tpu.iota {dimensions = array<i32: 1>} : vector<16x128xi32>
    %3 = vector.broadcast %0 : vector<16x1xi32> to vector<16x128xi32>
    %4 = arith.cmpi eq, %2, %3 : vector<16x128xi32>
    %5 = arith.extui %4 : vector<16x128xi1> to vector<16x128xi32>
    %6 = arith.sitofp %5 : vector<16x128xi32> to vector<16x128xf32>
    %c0_3 = arith.constant 0 : index
    %c0_4 = arith.constant 0 : index
    %7 = vector.load %arg3[%c0_3, %c0_4] : memref<128x128xf32, #tpu.memory_space<vmem>>, vector<128x128xf32>
    %cst = arith.constant dense<0.000000e+00> : vector<16x128xf32>
    %8 = tpu.matmul %6, %7, %cst {dimension_numbers = #tpu.dot_dimension_numbers<[1], [0], [0], [1], [0, 0, 1, 1], [], []>} : vector<16x128xf32>, vector<128x128xf32>, vector<16x128xf32> -> vector<16x128xf32>
    %c0_5 = arith.constant 0 : index
    %c0_6 = arith.constant 0 : index
    %9 = vector.load %arg4[%c0_5, %c0_6] : memref<16x128xf32, #tpu.memory_space<vmem>>, vector<16x128xf32>
    tpu.vector_store %arg4[%c0_5, %c0_6], %8 {strides = array<i32>} : memref<16x128xf32, #tpu.memory_space<vmem>>, vector<16x128xf32>,
    %cst_7 = arith.constant dense<0xFF800000> : vector<16xf32>
    %10 = vector.multi_reduction <maximumf>, %8, %cst_7 [1] : vector<16x128xf32> to vector<16xf32>
    %11 = vector.shape_cast %10 : vector<16xf32> to vector<16x1xf32>
    %12 = vector.broadcast %11 : vector<16x1xf32> to vector<16x128xf32>
    %13 = arith.subf %8, %12 : vector<16x128xf32>
    %14 = math.exp %13 : vector<16x128xf32>
    %cst_8 = arith.constant dense<0.000000e+00> : vector<16xf32>
    %15 = vector.multi_reduction <add>, %14, %cst_8 [1] : vector<16x128xf32> to vector<16xf32>
    %16 = vector.shape_cast %15 : vector<16xf32> to vector<16x1xf32>
    %17 = math.log %16 : vector<16x1xf32>
    %18 = vector.broadcast %1 : vector<16x1xi32> to vector<16x128xi32>
    %19 = arith.cmpi eq, %2, %18 : vector<16x128xi32>
    %20 = arith.extui %19 : vector<16x128xi1> to vector<16x128xi32>
    %21 = arith.sitofp %20 : vector<16x128xi32> to vector<16x128xf32>
    %22 = arith.mulf %21, %13 : vector<16x128xf32>
    %cst_9 = arith.constant dense<0.000000e+00> : vector<16xf32>
    %23 = vector.multi_reduction <add>, %22, %cst_9 [1] : vector<16x128xf32> to vector<16xf32>
    %24 = vector.shape_cast %23 : vector<16xf32> to vector<16x1xf32>
    %25 = arith.subf %17, %24 : vector<16x1xf32>
    %c16_i32 = arith.constant 16 : i32
    %26 = arith.muli %arg0, %c16_i32 : i32
    %27 = tpu.iota {dimensions = array<i32: 0>} : vector<16x1xi32>
    %28 = vector.broadcast %26 : i32 to vector<16x1xi32>
    %29 = arith.addi %28, %27 : vector<16x1xi32>
    %c16_i32_10 = arith.constant 16 : i32
    %30 = vector.broadcast %c16_i32_10 : i32 to vector<16x1xi32>
    %31 = arith.cmpi slt, %29, %30 : vector<16x1xi32>
    %cst_11 = arith.constant 0.000000e+00 : f32
    %32 = vector.broadcast %cst_11 : f32 to vector<16x1xf32>
    %33 = arith.select %31, %25, %32 : vector<16x1xi1>, vector<16x1xf32>
    %34 = vector.shape_cast %33 : vector<16x1xf32> to vector<1x16x1xf32>
    %cst_12 = arith.constant dense<0.000000e+00> : vector<1xf32>
    %35 = vector.multi_reduction <add>, %34, %cst_12 [1, 2] : vector<1x16x1xf32> to vector<1xf32>
    %36 = vector.shape_cast %35 : vector<1xf32> to vector<1x1x1xf32>
    %37 = vector.extract %36[0, 0, 0] : f32 from vector<1x1x1xf32>
    %c0_13 = arith.constant 0 : index
    %c0_14 = arith.constant 0 : index
    %38 = memref.load %arg5[%c0_13, %c0_14] : memref<1x1xf32, #tpu.memory_space<smem>>
    memref.store %37, %arg5[%c0_13, %c0_14] : memref<1x1xf32, #tpu.memory_space<smem>>
    return
  }
  func.func @transform_0(%arg0: i32) -> (i32, i32) {
    %c0_i32 = arith.constant 0 : i32
    %c0_i32_0 = arith.constant 0 : i32
    return %arg0, %c0_i32 : i32, i32
  }
  func.func @transform_1(%arg0: i32) -> (i32, i32) {
    %c0_i32 = arith.constant 0 : i32
    %c0_i32_0 = arith.constant 0 : i32
    return %arg0, %c0_i32 : i32, i32
  }
  func.func @transform_2(%arg0: i32) -> (i32, i32) {
    %c0_i32 = arith.constant 0 : i32
    %c0_i32_0 = arith.constant 0 : i32
    %c0_i32_1 = arith.constant 0 : i32
    return %c0_i32, %c0_i32_0 : i32, i32
  }
  func.func @transform_3(%arg0: i32) -> (i32, i32) {
    %c0_i32 = arith.constant 0 : i32
    %c0_i32_0 = arith.constant 0 : i32
    return %arg0, %c0_i32 : i32, i32
  }
  func.func @transform_4(%arg0: i32) -> (i32, i32) {
    %c0_i32 = arith.constant 0 : i32
    %c0_i32_0 = arith.constant 0 : i32
    return %arg0, %c0_i32 : i32, i32
  }
}

</mosaic_0001>

<bundles_post_ra>
// kernel: bigram_forward.1
= control target key start
LH: loop header
LB: loop body
LE: loop exit
PB: predicated region body
PF: predicated region fallthrough
CT: control target
= control target key end

     0   :  { %10 = vsyncpa [#allocation3], 0  ;;  %s495_s0 = inlined_call_operand.vmem [shape: s32[16,1], index: 0, kind: input, shape index: {}]   ;;  %s496_s1 = inlined_call_operand.vmem [shape: s32[16,1], index: 1, kind: input, shape index: {}]   ;;  %s497_s2 = inlined_call_operand.hbm [shape: f32[128,128], index: 2, kind: input, shape index: {}]   ;;  %s498_s3 = inlined_call_operand.hbm [shape: f32[16,128], index: 3, kind: output, shape index: {0}]   ;;  %s499_s4 = inlined_call_operand.hbm [shape: f32[1,1], index: 4, kind: output, shape index: {1}]  }
   0x1   :  { %11 = vsyncpa [#allocation4], 0 }
   0x2   :  { %12 = vsyncpa [#allocation5], 0  ;;  %s408_s15 = smov [#allocation2]   ;;  %s348_s19 = scalar_lea.hbm %s497_s2, 2048 }
   0x3   :  { %s22_s16 = sshll.u32 %s408_s15, 4  ;;  %p349_p0 = scmp.ne.s32.totalorder %s497_s2, %s348_s19  ;;  %s23_s16 = int_to_ptr.vmem [resolvable:$true] %s22_s16 }
   0x4   :  { %p352_p1 = scmp.lt.u32.totalorder %s348_s19, %s497_s2 }
   0x6   :  { %p354_p2 = pnand %p352_p1, %p349_p0 }
   0x8   :  { %357 = shalt.err (!%p354_p2)
}
   0x9   :  { %s358_s24 = scalar_lea.vmem %s23_s16, 2048  ;;  %p363_p4 = scmp.lt.s32.totalorder %s23_s16, %s23_s16 }
   0xa   :  { %p359_p3 = scmp.ne.s32.totalorder %s23_s16, %s358_s24  ;;  %p364_p5 = scmp.lt.s32.totalorder %s358_s24, %s358_s24 }
   0xc   :  { %p365_p6 = por %p364_p5, %p363_p4 }
   0xe   :  { %p366_p7 = pnand %p365_p6, %p359_p3 }
  0x10   :  { %369 = shalt.err (!%p366_p7)
}
  0x11   :  { %s409_s25 = smov 128   ;;  %s410_s26 = smov 8  }
  0x12   :  { %28 = dma.hbm_to_vmem [thread:$0]  %s497_s2, 2048, %s23_s16, [#allocation3], %s409_s25, %s409_s25, %s410_s26  }
  0x13   :  { %402 = dma.done.wait [#allocation3], 2048  }
  0x14   :  { %403 = vsyncadd [#allocation3], 4294965248  ;;  %v411_v0 = vmov 0   ;;  %v32_v1 = vld [vmem:[%s495_s0] sm:$0xff]  ;;  %v51_v3 = vld [vmem:[#allocation2 + $0x8] sm:$0xff]  ;;  %v36_v28 = vlaneseq  ;;  %v412_v31 = vmov 1.0  }
  0x15   :  { %338 = vset.pattern.permute.xlu0 %v411_v0  ;;  %339 = vset.pattern.permute.xlu1 %v411_v0  ;;  %v50_v2 = vld [vmem:[#allocation2] sm:$0xff]  ;;  %v52_v4 = vld [vmem:[#allocation2 + $0x10] sm:$0xff]  ;;  %v33_v5 = vld [vmem:[%s495_s0 + $0x8] sm:$0xff]  ;;  %v413_v46 = vmov 0.0   ;;  %vm192_vm4 = vcmask 7168  }
  0x16   :  { %39 = vperm.xlu0 %338, %v32_v1   ;;  %v296_v6 = vpack.c.bf16 %v51_v3, %v50_v2  ;;  %v53_v7 = vld [vmem:[#allocation2 + $0x18] sm:$0xff]  ;;  %v54_v9 = vld [vmem:[#allocation2 + $0x20] sm:$0xff]  ;;  %v55_v10 = vld [vmem:[#allocation2 + $0x28] sm:$0xff]  ;;  %v37_v29 = vand.u32 127, %v36_v28 }
  0x17   :  { %v300_v8 = vpack.c.bf16 %v53_v7, %v52_v4  ;;  %v34_v11 = vld [vmem:[%s496_s1] sm:$0xff]  ;;  %v304_v12 = vpack.c.bf16 %v55_v10, %v54_v9  ;;  %v56_v13 = vld [vmem:[#allocation2 + $0x30] sm:$0xff]  ;;  %v57_v14 = vld [vmem:[#allocation2 + $0x38] sm:$0xff] }
  0x18   :  { %297 = vmatprep.subr.bf16.mxu0 %v296_v6  ;;  %v308_v15 = vpack.c.bf16 %v57_v14, %v56_v13  ;;  %v58_v16 = vld [vmem:[#allocation2 + $0x40] sm:$0xff]  ;;  %v59_v17 = vld [vmem:[#allocation2 + $0x48] sm:$0xff]  ;;  %v60_v19 = vld [vmem:[#allocation2 + $0x50] sm:$0xff] }
  0x19   :  { %299 = vmatpush3.bf16.msra.mxu0 %v296_v6  ;;  %v312_v18 = vpack.c.bf16 %v59_v17, %v58_v16  ;;  %v61_v20 = vld [vmem:[#allocation2 + $0x58] sm:$0xff]  ;;  %v62_v22 = vld [vmem:[#allocation2 + $0x60] sm:$0xff]  ;;  %v63_v23 = vld [vmem:[#allocation2 + $0x68] sm:$0xff] }
  0x1a   :  { %42 = vperm.xlu0 %338, %v33_v5   ;;  %301 = vmatprep.subr.bf16.mxu0 %v300_v8  ;;  %v316_v21 = vpack.c.bf16 %v61_v20, %v60_v19  ;;  %v320_v24 = vpack.c.bf16 %v63_v23, %v62_v22  ;;  %v64_v25 = vld [vmem:[#allocation2 + $0x70] sm:$0xff]  ;;  %v65_v26 = vld [vmem:[#allocation2 + $0x78] sm:$0xff]  ;;  %v35_v35 = vld [vmem:[%s496_s1 + $0x8] sm:$0xff]  ;;  %s414_s1 = smov [#allocation6]  }
  0x1b   :  { %v324_v27 = vpack.c.bf16 %v65_v26, %v64_v25  ;;  %s212_s9 = sshll.u32 %s414_s1, 4  ;;  %s213_s9 = int_to_ptr.vmem [resolvable:$true] %s212_s9 }
  0x1c   :  { %s370_s10 = scalar_lea.vmem %s213_s9, 256  ;;  %p375_p9 = scmp.lt.s32.totalorder %s213_s9, %s213_s9 }
  0x1d   :  { %303 = vmatpush3.bf16.msra.mxu0 %v300_v8  ;;  %p371_p8 = scmp.ne.s32.totalorder %s213_s9, %s370_s10  ;;  %p376_p10 = scmp.lt.s32.totalorder %s370_s10, %s370_s10 }
  0x1e   :  { %162 = vperm.xlu0 %338, %v34_v11   ;;  %305 = vmatprep.subr.bf16.mxu0 %v304_v12 }
  0x1f   :  { %p377_p11 = por %p376_p10, %p375_p9 }
  0x21   :  { %307 = vmatpush3.bf16.msra.mxu0 %v304_v12  ;;  %p378_p12 = pnand %p377_p11, %p371_p8 }
  0x22   :  { %309 = vmatprep.subr.bf16.mxu0 %v308_v15 }
  0x25   :  { %311 = vmatpush3.bf16.msra.mxu0 %v308_v15 }
  0x26   :  { %313 = vmatprep.subr.bf16.mxu0 %v312_v18 }
  0x29   :  { %315 = vmatpush3.bf16.msra.mxu0 %v312_v18 }
  0x2a   :  { %317 = vmatprep.subr.bf16.mxu0 %v316_v21 }
  0x2d   :  { %319 = vmatpush3.bf16.msra.mxu0 %v316_v21 }
  0x2e   :  { %321 = vmatprep.subr.bf16.mxu0 %v320_v24 }
  0x31   :  { %323 = vmatpush3.bf16.msra.mxu0 %v320_v24 }
  0x32   :  { %325 = vmatprep.subr.bf16.mxu0 %v324_v27 }
  0x35   :  { %327 = vmatpush3.bf16.msra.mxu0 %v324_v27 }
  0x95   :  { %v40_v30 = vpop.permute.xlu0 %39 }
  0x96   :  { %vm44_vm0 = vcmp.eq.s32.totalorder %v37_v29, %v40_v30 }
  0x97   :  { %293 = vmatprep.mubr.msk.f32.mxu0 %vm44_vm0, %v412_v31 }
  0x99   :  { %v43_v32 = vpop.permute.xlu0 %42 }
  0x9a   :  { %vm45_vm1 = vcmp.eq.s32.totalorder %v37_v29, %v43_v32 }
  0x9b   :  { %294 = vmatmul.mubr.msk.f32.vlgmr.msra.gmra.mrb[0].mxu0 %vm45_vm1, %v412_v31 }
  0x9d   :  { %v163_v43 = vpop.permute.xlu0 %162 }
  0x9e   :  { %vm167_vm2 = vcmp.eq.s32.totalorder %v37_v29, %v163_v43 }
  0x9f   :  { %v241_v47 = vsel %vm167_vm2, 1.0, %v413_v46 }
 0x16e   :  { %v295_v33 = vpop.f32.mrb[0].mxu0 }
 0x16f   :  { %142 = vst [vmem:[#allocation6 + $0x8] sm:$0xff] %v295_v33  ;;  %145 = vmax.xlane.f32.xlu1 %v295_v33  ;;  %v132_v34 = vpop.f32.mrb[1].mxu0 }
 0x170   :  { %141 = vst [vmem:[#allocation6] sm:$0xff] %v132_v34 }
 0x173   :  { %143 = vmax.xlane.f32.xlu1 %v132_v34 }
 0x184   :  { %165 = vperm.xlu1 %339, %v35_v35  }
 0x1fc   :  { %v146_v36 = vpop.xlane.xlu1 %145 }
 0x1fd   :  { %v148_v37 = vsub.f32 %v295_v33, %v146_v36 }
 0x1ff   :  { %v151_v38 = vmul.f32 1.442695, %v148_v37 }
 0x200   :  { %v144_v39 = vpop.xlane.xlu1 %143 }
 0x201   :  { %340 = vpow2.f32 %v151_v38  ;;  %v147_v40 = vsub.f32 %v132_v34, %v144_v39 }
 0x203   :  { %v149_v41 = vmul.f32 1.442695, %v147_v40  ;;  %v173_v48 = vmul.f32 %v241_v47, %v147_v40 }
 0x204   :  { %v166_v44 = vpop.permute.xlu1 %165 }
 0x205   :  { %342 = vpow2.f32 %v149_v41  ;;  %vm168_vm3 = vcmp.eq.s32.totalorder %v37_v29, %v166_v44 }
 0x206   :  { %v242_v49 = vsel %vm168_vm3, 1.0, %v413_v46 }
 0x207   :  { %v174_v50 = vmul.f32 %v242_v49, %v148_v37 }
 0x20b   :  { %v341_v42 = vpop.eup %340 }
 0x20c   :  { %155 = vadd.xlane.f32.xlu1 %v341_v42 }
 0x20f   :  { %v343_v45 = vpop.eup %342 }
 0x210   :  { %153 = vadd.xlane.f32.xlu0 %v343_v45 }
 0x214   :  { %175 = vadd.xlane.f32.xlu0 %v173_v48 }
 0x218   :  { %177 = vadd.xlane.f32.xlu0 %v174_v50 }
 0x299   :  { %v156_v51 = vpop.xlane.xlu1 %155 }
 0x29a   :  { %344 = vlog2.f32 %v156_v51 }
 0x29d   :  { %v154_v52 = vpop.xlane.xlu0 %153 }
 0x29e   :  { %346 = vlog2.f32 %v154_v52 }
 0x2a1   :  { %v176_v53 = vpop.xlane.xlu0 %175 }
 0x2a4   :  { %v345_v54 = vpop.eup %344 }
 0x2a5   :  { %v160_v55 = vmul.f32 0.6931472, %v345_v54  ;;  %v178_v56 = vpop.xlane.xlu0 %177 }
 0x2a7   :  { %v180_v59 = vsub.f32 %v160_v55, %v178_v56 }
 0x2a8   :  { %v347_v57 = vpop.eup %346 }
 0x2a9   :  { %v158_v58 = vmul.f32 0.6931472, %v347_v57  ;;  %v194_v62 = vsel %vm192_vm4, %v180_v59, 0.0 }
 0x2ab   :  { %v179_v60 = vsub.f32 %v158_v58, %v176_v53 }
 0x2ad   :  { %v193_v61 = vsel %vm192_vm4, %v179_v60, 0.0 }
 0x2ae   :  { %v195_v63 = vadd.f32 %v194_v62, %v193_v61 }
 0x2b0   :  { %196 = vadd.xlane.f32.xlu0 %v195_v63 }
 0x2b1   :  { %381 = shalt.err (!%p378_p12)
}
 0x2b2   :  { %s382_s13 = scalar_lea.hbm %s498_s3, 256 }
 0x2b3   :  { %p383_p13 = scmp.ne.s32.totalorder %s498_s3, %s382_s13  ;;  %p386_p0 = scmp.lt.u32.totalorder %s382_s13, %s498_s3 }
 0x2b5   :  { %p388_p1 = pnand %p386_p0, %p383_p13 }
 0x2b7   :  { %391 = shalt.err (!%p388_p1)
}
 0x2b8   :  { %218 = dma.vmem_to_hbm [thread:$0]  %s213_s9, 256, %s498_s3, [#allocation4], %s409_s25, %s409_s25, %s410_s26  }
 0x2b9   :  { %s392_s23 = scalar_lea.hbm %s499_s4, 16 }
 0x2ba   :  { %p393_p2 = scmp.ne.s32.totalorder %s499_s4, %s392_s23  ;;  %p396_p3 = scmp.lt.u32.totalorder %s392_s23, %s499_s4 }
 0x2bc   :  { %p398_p4 = pnand %p396_p3, %p393_p2 }
 0x33d   :  { %v197_v0 = vpop.xlane.xlu0 %196 }
 0x33e   :  { %v198_v1 = vrot.slane %v197_v0, 4 }
 0x340   :  { %v199_v2 = vadd.f32 %v198_v1, %v197_v0 }
 0x342   :  { %v200_v3 = vrot.slane %v199_v2, 2 }
 0x344   :  { %v201_v4 = vadd.f32 %v200_v3, %v199_v2 }
 0x346   :  { %v202_v5 = vrot.slane %v201_v4, 1 }
 0x348   :  { %v203_v6 = vadd.f32 %v202_v5, %v201_v4 }
 0x34a   :  { %328 = vpush %v203_v6 }
 0x37b   :  { %s329_s20 = spop %328 }
 0x37c   :  { %206 = sst [smem:[#allocation7]] %s329_s20 }
 0x37d   :  { %401 = shalt.err (!%p398_p4)
}
 0x37e   :  { %s415_s25 = smov [#allocation7]  }
 0x37f   :  { %226 = dma.smem_to_hbm %s415_s25, 16, %s499_s4, [#allocation5]  }
 0x380   :  { %404 = dma.done.wait [#allocation4], 256  }
 0x381   :  { %405 = vsyncadd [#allocation4], 4294967040 }
 0x382   :  { %406 = dma.done.wait [#allocation5], 16  }
 0x383   :  { %407 = vsyncadd [#allocation5], 4294967280 }
 0x384   :  { %233 = sfence }
 0x385   :  { %234 = vsyncpa [#allocation3], 1 }
 0x386   :  { %235 = vsyncpa [#allocation4], 1 }
 0x387   :  { %236 = vsyncpa [#allocation5], 1 }

</bundles_post_ra>
